<compile_context>
chip_gen: v5e
topology: v5e:2x2
jax: 0.10.0
libtpu: 0.0.40
codegen_flags: <defaults>
</compile_context>

<pallas_src>
import jax
import jax.numpy as jnp
from jax.experimental import pallas as pl
from jax.experimental.pallas import tpu as pltpu


def _zero_mul_kernel(x_ref, o_ref):
    # Lane-dense block: one full-width load, one multiply, one full-width store.
    x = x_ref[...]
    # Zero of the input dtype: floats keep exact x*0.0 semantics (NaN/Inf/-0.0
    # propagate); integer inputs stay integer instead of promoting to f32.
    o_ref[...] = (x * jnp.zeros((), dtype=x.dtype)).astype(o_ref.dtype)


_LANE_CANDIDATES = (2048, 1024, 512, 256, 128)


def _choose_layout(total, itemsize):
    """Pick a lane-dense (rows, lanes) factorization and a row-block size."""
    lanes = None
    for cand in _LANE_CANDIDATES:
        if total % cand == 0:
            lanes = cand
            break
    if lanes is None:
        return None
    rows = total // lanes

    # ~3 MiB per block buffer; with in+out each double-buffered that is 12 MiB
    # of VMEM — safe under every generation's default scoped-VMEM limit.
    target_bytes = 3 << 20
    tr = max(1, target_bytes // (lanes * itemsize))
    if tr >= rows:
        if rows >= 16:
            # Guarantee >= 2 grid steps so the "parallel" axis feeds both
            # TensorCores on v7x (harmless on v5e/v6e).
            tr = max(8, ((rows // 2) // 8) * 8)
        else:
            tr = rows               # full-extent block is always legal
    else:
        tr = max(8, (tr // 8) * 8)  # keep the (8, 128) tiling constraint
    return rows, lanes, tr


def _zero_mul_tiled(x2d, rows, lanes, tr, dtype, allow_fusion):
    nbytes = rows * lanes * dtype.itemsize
    return pl.pallas_call(
        _zero_mul_kernel,
        out_shape=jax.ShapeDtypeStruct((rows, lanes), dtype),
        grid_spec=pltpu.PrefetchScalarGridSpec(
            num_scalar_prefetch=0,
            grid=(pl.cdiv(rows, tr),),
            in_specs=[pl.BlockSpec((tr, lanes), lambda i: (i, 0))],
            out_specs=pl.BlockSpec((tr, lanes), lambda i: (i, 0)),
        ),
        compiler_params=pltpu.CompilerParams(
            dimension_semantics=("parallel",),
            # Let XLA fuse the strided-slice / reshape producer into the Pallas
            # input DMA on the stride>1 path (no extra HBM round trip).
            allow_input_fusion=[True] if allow_fusion else None,
        ),
        cost_estimate=pl.CostEstimate(
            flops=rows * lanes, transcendentals=0, bytes_accessed=2 * nbytes),
    )(x2d)


def _zero_mul_flat(x_flat, dtype, allow_fusion):
    total = x_flat.size
    layout = _choose_layout(total, dtype.itemsize)
    if layout is None:
        # Element count not a multiple of 128: pad to a lane-aligned length and
        # reuse the tiled, pipelined path (instead of one whole-tensor VMEM
        # block), then slice the result back.
        pad = (-total) % 1024
        x_pad = jnp.pad(x_flat, (0, pad))
        rows, lanes, tr = _choose_layout(total + pad, dtype.itemsize)
        out2d = _zero_mul_tiled(x_pad.reshape(rows, lanes), rows, lanes, tr,
                                dtype, allow_fusion=False)
        return out2d.reshape(-1)[:total]

    rows, lanes, tr = layout
    out2d = _zero_mul_tiled(x_flat.reshape(rows, lanes), rows, lanes, tr,
                            dtype, allow_fusion)
    return out2d.reshape(-1)


def zero_forward(x, stride: int):
    """Pallas implementation of DARTS Zero.forward. x is NCHW."""
    stride = int(stride)
    if stride != 1:
        # Strided spatial subsample; with allow_input_fusion=[True] on the
        # pallas_call this slice fuses into the kernel's input DMA under jit.
        x = x[:, :, ::stride, ::stride]
        allow_fusion = True
    else:
        allow_fusion = False

    out_shape = x.shape
    dtype = x.dtype
    x_flat = x.reshape(-1)
    out_flat = _zero_mul_flat(x_flat, dtype, allow_fusion)
    return out_flat.reshape(out_shape)


if __name__ == "__main__":
    key = jax.random.PRNGKey(0)
    x = jax.random.normal(key, (2, 4, 16, 16), dtype=jnp.float32)

    zf = jax.jit(zero_forward, static_argnums=1)

    # stride = 1 case
    y1 = zf(x, 1)
    jax.block_until_ready(y1)
    assert y1.shape == (2, 4, 16, 16) and y1.dtype == x.dtype
    assert bool(jnp.all(y1 == 0.0))

    # stride = 2 case (strided spatial subsampling, then * 0.0)
    y2 = zf(x, 2)
    jax.block_until_ready(y2)
    assert y2.shape == (2, 4, 8, 8)
    assert bool(jnp.all(y2 == 0.0))

    # NaN propagation matches PyTorch's x * 0.0 (NaN stays NaN).
    xn = x.at[0, 0, 0, 0].set(jnp.nan)
    yn1 = zf(xn, 1)
    yn2 = zf(xn, 2)
    jax.block_until_ready((yn1, yn2))
    assert bool(jnp.isnan(yn1[0, 0, 0, 0]))
    assert bool(jnp.isnan(yn2[0, 0, 0, 0]))

    # Non-128-multiple element count exercises the padded fallback path.
    x_odd = jax.random.normal(key, (2, 3, 5, 7), dtype=jnp.float32)
    y_odd1 = zf(x_odd, 1)
    y_odd2 = zf(x_odd, 2)
    jax.block_until_ready((y_odd1, y_odd2))
    assert y_odd1.shape == (2, 3, 5, 7)
    assert y_odd2.shape == (2, 3, 3, 4)
    assert bool(jnp.all(y_odd1 == 0.0)) and bool(jnp.all(y_odd2 == 0.0))

    print("KERNEL_OK")
</pallas_src>

<mosaic_0001>
module attributes {stable_mosaic.version = 11 : i64} {
  func.func @_zero_mul_kernel(%arg0: i32, %arg1: memref<1x2048xf32, #tpu.memory_space<vmem>>, %arg2: memref<1x2048xf32, #tpu.memory_space<vmem>>) attributes {dimension_semantics = [#tpu.dimension_semantics<parallel>], iteration_bounds = array<i64: 1>, scalar_prefetch = 0 : i64, scratch_operands = 0 : i64, tpu.core_type = #tpu.core_type<tc>, window_params = [{transform_indices = @transform_0, window_bounds = array<i64: 1, 2048>}, {transform_indices = @transform_1, window_bounds = array<i64: 1, 2048>}]} {
    %c0 = arith.constant 0 : index
    %c0_0 = arith.constant 0 : index
    %0 = vector.load %arg1[%c0, %c0_0] : memref<1x2048xf32, #tpu.memory_space<vmem>>, vector<1x2048xf32>
    %cst = arith.constant 0.000000e+00 : f32
    %1 = vector.broadcast %cst : f32 to vector<1x2048xf32>
    %2 = arith.mulf %0, %1 : vector<1x2048xf32>
    %c0_1 = arith.constant 0 : index
    %c0_2 = arith.constant 0 : index
    %3 = vector.load %arg2[%c0_1, %c0_2] : memref<1x2048xf32, #tpu.memory_space<vmem>>, vector<1x2048xf32>
    tpu.vector_store %arg2[%c0_1, %c0_2], %2 {strides = array<i32>} : memref<1x2048xf32, #tpu.memory_space<vmem>>, vector<1x2048xf32>,
    return
  }
  func.func @transform_0(%arg0: i32) -> (i32, i32) {
    %c0_i32 = arith.constant 0 : i32
    %c0_i32_0 = arith.constant 0 : i32
    return %arg0, %c0_i32 : i32, i32
  }
  func.func @transform_1(%arg0: i32) -> (i32, i32) {
    %c0_i32 = arith.constant 0 : i32
    %c0_i32_0 = arith.constant 0 : i32
    return %arg0, %c0_i32 : i32, i32
  }
}

</mosaic_0001>

<bundles_post_ra>
// kernel: zero_forward.1
= control target key start
LH: loop header
LB: loop body
LE: loop exit
PB: predicated region body
PF: predicated region fallthrough
CT: control target
= control target key end

     0   :  { %s40_s0 = inlined_call_operand.vmem [shape: f32[1,2048], index: 0, kind: input, shape index: {}]   ;;  %s41_s1 = inlined_call_operand.vmem [shape: f32[1,2048], index: 1, kind: output, shape index: {}]  }
   0x1   :  { %v8_v0 = vld [vmem:[%s40_s0] sm:$0xff]  ;;  %v9_v1 = vld [vmem:[%s40_s0 + $0x8] sm:$0xff] }
   0x2   :  { %v10_v2 = vmul.f32 0.0, %v8_v0  ;;  %v11_v3 = vmul.f32 0.0, %v9_v1 }
   0x4   :  { %12 = vst [vmem:[%s41_s1] sm:$0xff] %v10_v2 }
   0x5   :  { %13 = vst [vmem:[%s41_s1 + $0x8] sm:$0xff] %v11_v3 }

</bundles_post_ra>
